<compile_context>
chip_gen: v5e
topology: v5e:2x2
jax: 0.10.0
libtpu: 0.0.40
codegen_flags: <defaults>
</compile_context>

<pallas_src>
import functools

import jax
import jax.numpy as jnp
from jax import lax
from jax.experimental import pallas as pl
from jax.experimental.pallas import tpu as pltpu

EPS = 1e-5


def _conv3x3_from_halo(halo_ref, col, w_mat, H, W):
    """3x3 conv (stride 1, pad 1) from a zero-haloed flat activation buffer.

    halo_ref: (Cin, H*W + 2*(W+1)) VMEM ref; interior lives at [W+1, W+1+H*W).
              The zero halo handles the top/bottom (height) border.
    col:      (1, H*W) int32, column index (p % W) for each flat position.
    w_mat:    (Cout, 9*Cin) weights, K ordered as (kh, kw, cin).
    returns:  (Cout, H*W) float32.
    """
    HW = H * W
    pad = W + 1
    taps = []
    for kh in range(3):
        for kw in range(3):
            dh, dw = kh - 1, kw - 1
            start = pad + dh * W + dw            # static, in [0, 2*(W+1)]
            t = halo_ref[:, start:start + HW]    # (Cin, HW) lane-shifted view
            if dw == -1:                         # width border: kill wrapped cols
                t = jnp.where(col >= 1, t, 0.0)
            elif dw == 1:
                t = jnp.where(col <= W - 2, t, 0.0)
            taps.append(t)
    patches = jnp.concatenate(taps, axis=0)      # (9*Cin, HW)
    return jnp.dot(w_mat, patches, preferred_element_type=jnp.float32)


def _basic_block_kernel(H, W,
                        x_ref, col_ref, w1_ref, b1_ref, w2_ref, b2_ref,
                        o_ref, xh_ref, mid_ref):
    HW = H * W
    pad = W + 1

    x = x_ref[0].astype(jnp.float32)             # (Cin, HW), lane-dense
    col = col_ref[...]                           # (1, HW) int32

    # In-kernel zero padding: stage x into the haloed scratch (VMEM only).
    xh_ref[...] = jnp.zeros_like(xh_ref)
    xh_ref[:, pad:pad + HW] = x

    # conv1 (BN1 scale folded into weights) + bias + ReLU
    y1 = _conv3x3_from_halo(xh_ref, col, w1_ref[...], H, W) + b1_ref[...]
    y1 = jnp.maximum(y1, 0.0)

    # Intermediate activation stays in VMEM, restaged with a zero halo.
    mid_ref[...] = jnp.zeros_like(mid_ref)
    mid_ref[:, pad:pad + HW] = y1

    # conv2 (BN2 folded) + bias + residual add + ReLU
    y2 = _conv3x3_from_halo(mid_ref, col, w2_ref[...], H, W) + b2_ref[...]
    y2 = jnp.maximum(y2 + x, 0.0)
    o_ref[0] = y2.astype(o_ref.dtype)


def _fold_bn(gamma, beta, mean, var):
    scale = gamma / jnp.sqrt(var + EPS)
    return scale, beta - mean * scale


def _fold_conv_bn_weight(w_oihw, scale):
    # (Cout, Cin, 3, 3) -> (Cout, 9*Cin), K ordered (kh, kw, cin),
    # with the eval-mode BN scale folded into the output-channel axis.
    cout, cin, kh, kw = w_oihw.shape
    w = jnp.transpose(w_oihw, (0, 2, 3, 1)).reshape(cout, kh * kw * cin)
    return w * scale[:, None]


def basic_block_forward(x_nchw, params):
    """BasicBlock forward, stride=1, downsample=None.  Input/output are NCHW."""
    N, C, H, W = x_nchw.shape
    HW = H * W
    halo = HW + 2 * (W + 1)

    s1, b1 = _fold_bn(params["bn1_gamma"], params["bn1_beta"],
                      params["bn1_mean"], params["bn1_var"])
    s2, b2 = _fold_bn(params["bn2_gamma"], params["bn2_beta"],
                      params["bn2_mean"], params["bn2_var"])
    w1 = _fold_conv_bn_weight(params["conv1_w"], s1)   # (Cmid, 9*C)
    w2 = _fold_conv_bn_weight(params["conv2_w"], s2)   # (Cout, 9*Cmid)
    Cmid, Cout = w1.shape[0], w2.shape[0]

    x_flat = x_nchw.reshape(N, C, HW)                  # free reshape, stays NCHW
    col_ids = (jnp.arange(HW, dtype=jnp.int32) % W).reshape(1, HW)

    kernel = functools.partial(_basic_block_kernel, H, W)

    out_flat = pl.pallas_call(
        kernel,
        out_shape=jax.ShapeDtypeStruct((N, Cout, HW), x_nchw.dtype),
        grid=(N,),
        in_specs=[
            pl.BlockSpec((1, C, HW), lambda n: (n, 0, 0)),      # x
            pl.BlockSpec((1, HW), lambda n: (0, 0)),            # column ids
            pl.BlockSpec((Cmid, 9 * C), lambda n: (0, 0)),      # w1 (BN folded)
            pl.BlockSpec((Cmid, 1), lambda n: (0, 0)),          # b1
            pl.BlockSpec((Cout, 9 * Cmid), lambda n: (0, 0)),   # w2 (BN folded)
            pl.BlockSpec((Cout, 1), lambda n: (0, 0)),          # b2
        ],
        out_specs=pl.BlockSpec((1, Cout, HW), lambda n: (n, 0, 0)),
        scratch_shapes=[
            pltpu.VMEM((C, halo), jnp.float32),       # haloed input
            pltpu.VMEM((Cmid, halo), jnp.float32),    # haloed intermediate
        ],
        compiler_params=pltpu.CompilerParams(
            dimension_semantics=("parallel",)),
    )(x_flat, col_ids, w1, b1.reshape(Cmid, 1), w2, b2.reshape(Cout, 1))

    return out_flat.reshape(N, Cout, H, W)


# ----------------------------- reference (pure JAX) -----------------------------

def _ref_forward(x, params):
    def conv(inp, w_oihw):
        return lax.conv_general_dilated(
            inp, w_oihw, window_strides=(1, 1), padding=((1, 1), (1, 1)),
            dimension_numbers=("NCHW", "OIHW", "NCHW"))

    def bn(inp, g, b, m, v):
        g, b, m, v = (t[None, :, None, None] for t in (g, b, m, v))
        return (inp - m) / jnp.sqrt(v + EPS) * g + b

    out = conv(x, params["conv1_w"])
    out = bn(out, params["bn1_gamma"], params["bn1_beta"],
             params["bn1_mean"], params["bn1_var"])
    out = jnp.maximum(out, 0.0)
    out = conv(out, params["conv2_w"])
    out = bn(out, params["bn2_gamma"], params["bn2_beta"],
             params["bn2_mean"], params["bn2_var"])
    return jnp.maximum(out + x, 0.0)


# ------------------------------------ main ---------------------------------------

if __name__ == "__main__":
    key = jax.random.PRNGKey(0)
    N, C, H, W = 2, 4, 16, 16          # inplanes == planes == 4, stride=1
    planes = C

    keys = jax.random.split(key, 10)
    x = jax.random.normal(keys[0], (N, C, H, W), dtype=jnp.float32)

    params = {
        "conv1_w": 0.1 * jax.random.normal(keys[1], (planes, C, 3, 3), jnp.float32),
        "conv2_w": 0.1 * jax.random.normal(keys[2], (planes, planes, 3, 3), jnp.float32),
        "bn1_gamma": 1.0 + 0.1 * jax.random.normal(keys[3], (planes,), jnp.float32),
        "bn1_beta": 0.1 * jax.random.normal(keys[4], (planes,), jnp.float32),
        "bn1_mean": 0.1 * jax.random.normal(keys[5], (planes,), jnp.float32),
        "bn1_var": 1.0 + 0.1 * jax.random.uniform(keys[6], (planes,), jnp.float32),
        "bn2_gamma": 1.0 + 0.1 * jax.random.normal(keys[7], (planes,), jnp.float32),
        "bn2_beta": 0.1 * jax.random.normal(keys[8], (planes,), jnp.float32),
        "bn2_mean": 0.1 * jax.random.normal(keys[9], (planes,), jnp.float32),
        "bn2_var": jnp.ones((planes,), jnp.float32),
    }

    out = jax.block_until_ready(basic_block_forward(x, params))
    ref = jax.block_until_ready(_ref_forward(x, params))

    assert out.shape == (N, C, H, W), out.shape
    max_err = float(jnp.max(jnp.abs(out - ref)))
    assert max_err < 1e-3, f"max abs error {max_err}"
    print("KERNEL_OK")
</pallas_src>

<mosaic_0001>
module attributes {stable_mosaic.version = 11 : i64} {
  func.func @_basic_block_kernel(%arg0: i32, %arg1: memref<1x4x256xf32, #tpu.memory_space<vmem>>, %arg2: memref<1x256xi32, #tpu.memory_space<vmem>>, %arg3: memref<4x36xf32, #tpu.memory_space<vmem>>, %arg4: memref<4x1xf32, #tpu.memory_space<vmem>>, %arg5: memref<4x36xf32, #tpu.memory_space<vmem>>, %arg6: memref<4x1xf32, #tpu.memory_space<vmem>>, %arg7: memref<1x4x256xf32, #tpu.memory_space<vmem>>, %arg8: memref<4x290xf32, #tpu.memory_space<vmem>>, %arg9: memref<4x290xf32, #tpu.memory_space<vmem>>) attributes {dimension_semantics = [#tpu.dimension_semantics<parallel>], iteration_bounds = array<i64: 2>, scalar_prefetch = 0 : i64, scratch_operands = 2 : i64, tpu.core_type = #tpu.core_type<tc>, window_params = [{transform_indices = @transform_0, window_bounds = array<i64: 1, 4, 256>}, {pipeline_mode = #tpu.pipeline_mode<synchronous>, transform_indices = @transform_1, window_bounds = array<i64: 1, 256>}, {pipeline_mode = #tpu.pipeline_mode<synchronous>, transform_indices = @transform_2, window_bounds = array<i64: 4, 36>}, {pipeline_mode = #tpu.pipeline_mode<synchronous>, transform_indices = @transform_3, window_bounds = array<i64: 4, 1>}, {pipeline_mode = #tpu.pipeline_mode<synchronous>, transform_indices = @transform_4, window_bounds = array<i64: 4, 36>}, {pipeline_mode = #tpu.pipeline_mode<synchronous>, transform_indices = @transform_5, window_bounds = array<i64: 4, 1>}, {transform_indices = @transform_6, window_bounds = array<i64: 1, 4, 256>}]} {
    %c0 = arith.constant 0 : index
    %c0_0 = arith.constant 0 : index
    %c0_1 = arith.constant 0 : index
    %0 = vector.load %arg1[%c0, %c0_0, %c0_1] : memref<1x4x256xf32, #tpu.memory_space<vmem>>, vector<1x4x256xf32>
    %1 = vector.shape_cast %0 : vector<1x4x256xf32> to vector<4x256xf32>
    %c0_2 = arith.constant 0 : index
    %c0_3 = arith.constant 0 : index
    %2 = vector.load %arg2[%c0_2, %c0_3] : memref<1x256xi32, #tpu.memory_space<vmem>>, vector<1x256xi32>
    %cst = arith.constant 0.000000e+00 : f32
    %3 = vector.broadcast %cst : f32 to vector<4x290xf32>
    %c0_4 = arith.constant 0 : index
    %c0_5 = arith.constant 0 : index
    %4 = vector.load %arg8[%c0_4, %c0_5] : memref<4x290xf32, #tpu.memory_space<vmem>>, vector<4x290xf32>
    tpu.vector_store %arg8[%c0_4, %c0_5], %3 {strides = array<i32>} : memref<4x290xf32, #tpu.memory_space<vmem>>, vector<4x290xf32>,
    %c0_6 = arith.constant 0 : index
    %c17 = arith.constant 17 : index
    %5 = vector.load %arg8[%c0_6, %c17] : memref<4x290xf32, #tpu.memory_space<vmem>>, vector<4x256xf32>
    tpu.vector_store %arg8[%c0_6, %c17], %1 {strides = array<i32>} : memref<4x290xf32, #tpu.memory_space<vmem>>, vector<4x256xf32>,
    %c0_7 = arith.constant 0 : index
    %c0_8 = arith.constant 0 : index
    %6 = vector.load %arg3[%c0_7, %c0_8] : memref<4x36xf32, #tpu.memory_space<vmem>>, vector<4x36xf32>
    %c0_9 = arith.constant 0 : index
    %c0_10 = arith.constant 0 : index
    %7 = vector.load %arg8[%c0_9, %c0_10] : memref<4x290xf32, #tpu.memory_space<vmem>>, vector<4x256xf32>
    %c1_i32 = arith.constant 1 : i32
    %8 = vector.broadcast %c1_i32 : i32 to vector<1x256xi32>
    %9 = arith.cmpi sge, %2, %8 : vector<1x256xi32>
    %cst_11 = arith.constant 0.000000e+00 : f32
    %10 = vector.shape_cast %9 : vector<1x256xi1> to vector<1x256xi1>
    %11 = vector.broadcast %10 : vector<1x256xi1> to vector<4x256xi1>
    %12 = vector.broadcast %cst_11 : f32 to vector<4x256xf32>
    %13 = arith.select %11, %7, %12 : vector<4x256xi1>, vector<4x256xf32>
    %c0_12 = arith.constant 0 : index
    %c1 = arith.constant 1 : index
    %14 = vector.load %arg8[%c0_12, %c1] : memref<4x290xf32, #tpu.memory_space<vmem>>, vector<4x256xf32>
    %c0_13 = arith.constant 0 : index
    %c2 = arith.constant 2 : index
    %15 = vector.load %arg8[%c0_13, %c2] : memref<4x290xf32, #tpu.memory_space<vmem>>, vector<4x256xf32>
    %c14_i32 = arith.constant 14 : i32
    %16 = vector.broadcast %c14_i32 : i32 to vector<1x256xi32>
    %17 = arith.cmpi sle, %2, %16 : vector<1x256xi32>
    %cst_14 = arith.constant 0.000000e+00 : f32
    %18 = vector.shape_cast %17 : vector<1x256xi1> to vector<1x256xi1>
    %19 = vector.broadcast %18 : vector<1x256xi1> to vector<4x256xi1>
    %20 = vector.broadcast %cst_14 : f32 to vector<4x256xf32>
    %21 = arith.select %19, %15, %20 : vector<4x256xi1>, vector<4x256xf32>
    %c0_15 = arith.constant 0 : index
    %c16 = arith.constant 16 : index
    %22 = vector.load %arg8[%c0_15, %c16] : memref<4x290xf32, #tpu.memory_space<vmem>>, vector<4x256xf32>
    %c1_i32_16 = arith.constant 1 : i32
    %23 = vector.broadcast %c1_i32_16 : i32 to vector<1x256xi32>
    %24 = arith.cmpi sge, %2, %23 : vector<1x256xi32>
    %cst_17 = arith.constant 0.000000e+00 : f32
    %25 = vector.shape_cast %24 : vector<1x256xi1> to vector<1x256xi1>
    %26 = vector.broadcast %25 : vector<1x256xi1> to vector<4x256xi1>
    %27 = vector.broadcast %cst_17 : f32 to vector<4x256xf32>
    %28 = arith.select %26, %22, %27 : vector<4x256xi1>, vector<4x256xf32>
    %c0_18 = arith.constant 0 : index
    %c17_19 = arith.constant 17 : index
    %29 = vector.load %arg8[%c0_18, %c17_19] : memref<4x290xf32, #tpu.memory_space<vmem>>, vector<4x256xf32>
    %c0_20 = arith.constant 0 : index
    %c18 = arith.constant 18 : index
    %30 = vector.load %arg8[%c0_20, %c18] : memref<4x290xf32, #tpu.memory_space<vmem>>, vector<4x256xf32>
    %c14_i32_21 = arith.constant 14 : i32
    %31 = vector.broadcast %c14_i32_21 : i32 to vector<1x256xi32>
    %32 = arith.cmpi sle, %2, %31 : vector<1x256xi32>
    %cst_22 = arith.constant 0.000000e+00 : f32
    %33 = vector.shape_cast %32 : vector<1x256xi1> to vector<1x256xi1>
    %34 = vector.broadcast %33 : vector<1x256xi1> to vector<4x256xi1>
    %35 = vector.broadcast %cst_22 : f32 to vector<4x256xf32>
    %36 = arith.select %34, %30, %35 : vector<4x256xi1>, vector<4x256xf32>
    %c0_23 = arith.constant 0 : index
    %c32 = arith.constant 32 : index
    %37 = vector.load %arg8[%c0_23, %c32] : memref<4x290xf32, #tpu.memory_space<vmem>>, vector<4x256xf32>
    %c1_i32_24 = arith.constant 1 : i32
    %38 = vector.broadcast %c1_i32_24 : i32 to vector<1x256xi32>
    %39 = arith.cmpi sge, %2, %38 : vector<1x256xi32>
    %cst_25 = arith.constant 0.000000e+00 : f32
    %40 = vector.shape_cast %39 : vector<1x256xi1> to vector<1x256xi1>
    %41 = vector.broadcast %40 : vector<1x256xi1> to vector<4x256xi1>
    %42 = vector.broadcast %cst_25 : f32 to vector<4x256xf32>
    %43 = arith.select %41, %37, %42 : vector<4x256xi1>, vector<4x256xf32>
    %c0_26 = arith.constant 0 : index
    %c33 = arith.constant 33 : index
    %44 = vector.load %arg8[%c0_26, %c33] : memref<4x290xf32, #tpu.memory_space<vmem>>, vector<4x256xf32>
    %c0_27 = arith.constant 0 : index
    %c34 = arith.constant 34 : index
    %45 = vector.load %arg8[%c0_27, %c34] : memref<4x290xf32, #tpu.memory_space<vmem>>, vector<4x256xf32>
    %c14_i32_28 = arith.constant 14 : i32
    %46 = vector.broadcast %c14_i32_28 : i32 to vector<1x256xi32>
    %47 = arith.cmpi sle, %2, %46 : vector<1x256xi32>
    %cst_29 = arith.constant 0.000000e+00 : f32
    %48 = vector.shape_cast %47 : vector<1x256xi1> to vector<1x256xi1>
    %49 = vector.broadcast %48 : vector<1x256xi1> to vector<4x256xi1>
    %50 = vector.broadcast %cst_29 : f32 to vector<4x256xf32>
    %51 = arith.select %49, %45, %50 : vector<4x256xi1>, vector<4x256xf32>
    %52 = tpu.concatenate %13, %14, %21, %28, %29, %36, %43, %44, %51 in 0 : vector<4x256xf32>, vector<4x256xf32>, vector<4x256xf32>, vector<4x256xf32>, vector<4x256xf32>, vector<4x256xf32>, vector<4x256xf32>, vector<4x256xf32>, vector<4x256xf32> -> vector<36x256xf32>
    %cst_30 = arith.constant dense<0.000000e+00> : vector<4x256xf32>
    %53 = tpu.matmul %6, %52, %cst_30 {dimension_numbers = #tpu.dot_dimension_numbers<[1], [0], [0], [1], [0, 0, 1, 1], [], []>} : vector<4x36xf32>, vector<36x256xf32>, vector<4x256xf32> -> vector<4x256xf32>
    %c0_31 = arith.constant 0 : index
    %c0_32 = arith.constant 0 : index
    %54 = vector.load %arg4[%c0_31, %c0_32] : memref<4x1xf32, #tpu.memory_space<vmem>>, vector<4x1xf32>
    %55 = vector.broadcast %54 : vector<4x1xf32> to vector<4x256xf32>
    %56 = arith.addf %53, %55 : vector<4x256xf32>
    %cst_33 = arith.constant 0.000000e+00 : f32
    %57 = vector.broadcast %cst_33 : f32 to vector<4x256xf32>
    %58 = arith.maximumf %56, %57 : vector<4x256xf32>
    %cst_34 = arith.constant 0.000000e+00 : f32
    %59 = vector.broadcast %cst_34 : f32 to vector<4x290xf32>
    %c0_35 = arith.constant 0 : index
    %c0_36 = arith.constant 0 : index
    %60 = vector.load %arg9[%c0_35, %c0_36] : memref<4x290xf32, #tpu.memory_space<vmem>>, vector<4x290xf32>
    tpu.vector_store %arg9[%c0_35, %c0_36], %59 {strides = array<i32>} : memref<4x290xf32, #tpu.memory_space<vmem>>, vector<4x290xf32>,
    %c0_37 = arith.constant 0 : index
    %c17_38 = arith.constant 17 : index
    %61 = vector.load %arg9[%c0_37, %c17_38] : memref<4x290xf32, #tpu.memory_space<vmem>>, vector<4x256xf32>
    tpu.vector_store %arg9[%c0_37, %c17_38], %58 {strides = array<i32>} : memref<4x290xf32, #tpu.memory_space<vmem>>, vector<4x256xf32>,
    %c0_39 = arith.constant 0 : index
    %c0_40 = arith.constant 0 : index
    %62 = vector.load %arg5[%c0_39, %c0_40] : memref<4x36xf32, #tpu.memory_space<vmem>>, vector<4x36xf32>
    %c0_41 = arith.constant 0 : index
    %c0_42 = arith.constant 0 : index
    %63 = vector.load %arg9[%c0_41, %c0_42] : memref<4x290xf32, #tpu.memory_space<vmem>>, vector<4x256xf32>
    %c1_i32_43 = arith.constant 1 : i32
    %64 = vector.broadcast %c1_i32_43 : i32 to vector<1x256xi32>
    %65 = arith.cmpi sge, %2, %64 : vector<1x256xi32>
    %cst_44 = arith.constant 0.000000e+00 : f32
    %66 = vector.shape_cast %65 : vector<1x256xi1> to vector<1x256xi1>
    %67 = vector.broadcast %66 : vector<1x256xi1> to vector<4x256xi1>
    %68 = vector.broadcast %cst_44 : f32 to vector<4x256xf32>
    %69 = arith.select %67, %63, %68 : vector<4x256xi1>, vector<4x256xf32>
    %c0_45 = arith.constant 0 : index
    %c1_46 = arith.constant 1 : index
    %70 = vector.load %arg9[%c0_45, %c1_46] : memref<4x290xf32, #tpu.memory_space<vmem>>, vector<4x256xf32>
    %c0_47 = arith.constant 0 : index
    %c2_48 = arith.constant 2 : index
    %71 = vector.load %arg9[%c0_47, %c2_48] : memref<4x290xf32, #tpu.memory_space<vmem>>, vector<4x256xf32>
    %c14_i32_49 = arith.constant 14 : i32
    %72 = vector.broadcast %c14_i32_49 : i32 to vector<1x256xi32>
    %73 = arith.cmpi sle, %2, %72 : vector<1x256xi32>
    %cst_50 = arith.constant 0.000000e+00 : f32
    %74 = vector.shape_cast %73 : vector<1x256xi1> to vector<1x256xi1>
    %75 = vector.broadcast %74 : vector<1x256xi1> to vector<4x256xi1>
    %76 = vector.broadcast %cst_50 : f32 to vector<4x256xf32>
    %77 = arith.select %75, %71, %76 : vector<4x256xi1>, vector<4x256xf32>
    %c0_51 = arith.constant 0 : index
    %c16_52 = arith.constant 16 : index
    %78 = vector.load %arg9[%c0_51, %c16_52] : memref<4x290xf32, #tpu.memory_space<vmem>>, vector<4x256xf32>
    %c1_i32_53 = arith.constant 1 : i32
    %79 = vector.broadcast %c1_i32_53 : i32 to vector<1x256xi32>
    %80 = arith.cmpi sge, %2, %79 : vector<1x256xi32>
    %cst_54 = arith.constant 0.000000e+00 : f32
    %81 = vector.shape_cast %80 : vector<1x256xi1> to vector<1x256xi1>
    %82 = vector.broadcast %81 : vector<1x256xi1> to vector<4x256xi1>
    %83 = vector.broadcast %cst_54 : f32 to vector<4x256xf32>
    %84 = arith.select %82, %78, %83 : vector<4x256xi1>, vector<4x256xf32>
    %c0_55 = arith.constant 0 : index
    %c17_56 = arith.constant 17 : index
    %85 = vector.load %arg9[%c0_55, %c17_56] : memref<4x290xf32, #tpu.memory_space<vmem>>, vector<4x256xf32>
    %c0_57 = arith.constant 0 : index
    %c18_58 = arith.constant 18 : index
    %86 = vector.load %arg9[%c0_57, %c18_58] : memref<4x290xf32, #tpu.memory_space<vmem>>, vector<4x256xf32>
    %c14_i32_59 = arith.constant 14 : i32
    %87 = vector.broadcast %c14_i32_59 : i32 to vector<1x256xi32>
    %88 = arith.cmpi sle, %2, %87 : vector<1x256xi32>
    %cst_60 = arith.constant 0.000000e+00 : f32
    %89 = vector.shape_cast %88 : vector<1x256xi1> to vector<1x256xi1>
    %90 = vector.broadcast %89 : vector<1x256xi1> to vector<4x256xi1>
    %91 = vector.broadcast %cst_60 : f32 to vector<4x256xf32>
    %92 = arith.select %90, %86, %91 : vector<4x256xi1>, vector<4x256xf32>
    %c0_61 = arith.constant 0 : index
    %c32_62 = arith.constant 32 : index
    %93 = vector.load %arg9[%c0_61, %c32_62] : memref<4x290xf32, #tpu.memory_space<vmem>>, vector<4x256xf32>
    %c1_i32_63 = arith.constant 1 : i32
    %94 = vector.broadcast %c1_i32_63 : i32 to vector<1x256xi32>
    %95 = arith.cmpi sge, %2, %94 : vector<1x256xi32>
    %cst_64 = arith.constant 0.000000e+00 : f32
    %96 = vector.shape_cast %95 : vector<1x256xi1> to vector<1x256xi1>
    %97 = vector.broadcast %96 : vector<1x256xi1> to vector<4x256xi1>
    %98 = vector.broadcast %cst_64 : f32 to vector<4x256xf32>
    %99 = arith.select %97, %93, %98 : vector<4x256xi1>, vector<4x256xf32>
    %c0_65 = arith.constant 0 : index
    %c33_66 = arith.constant 33 : index
    %100 = vector.load %arg9[%c0_65, %c33_66] : memref<4x290xf32, #tpu.memory_space<vmem>>, vector<4x256xf32>
    %c0_67 = arith.constant 0 : index
    %c34_68 = arith.constant 34 : index
    %101 = vector.load %arg9[%c0_67, %c34_68] : memref<4x290xf32, #tpu.memory_space<vmem>>, vector<4x256xf32>
    %c14_i32_69 = arith.constant 14 : i32
    %102 = vector.broadcast %c14_i32_69 : i32 to vector<1x256xi32>
    %103 = arith.cmpi sle, %2, %102 : vector<1x256xi32>
    %cst_70 = arith.constant 0.000000e+00 : f32
    %104 = vector.shape_cast %103 : vector<1x256xi1> to vector<1x256xi1>
    %105 = vector.broadcast %104 : vector<1x256xi1> to vector<4x256xi1>
    %106 = vector.broadcast %cst_70 : f32 to vector<4x256xf32>
    %107 = arith.select %105, %101, %106 : vector<4x256xi1>, vector<4x256xf32>
    %108 = tpu.concatenate %69, %70, %77, %84, %85, %92, %99, %100, %107 in 0 : vector<4x256xf32>, vector<4x256xf32>, vector<4x256xf32>, vector<4x256xf32>, vector<4x256xf32>, vector<4x256xf32>, vector<4x256xf32>, vector<4x256xf32>, vector<4x256xf32> -> vector<36x256xf32>
    %cst_71 = arith.constant dense<0.000000e+00> : vector<4x256xf32>
    %109 = tpu.matmul %62, %108, %cst_71 {dimension_numbers = #tpu.dot_dimension_numbers<[1], [0], [0], [1], [0, 0, 1, 1], [], []>} : vector<4x36xf32>, vector<36x256xf32>, vector<4x256xf32> -> vector<4x256xf32>
    %c0_72 = arith.constant 0 : index
    %c0_73 = arith.constant 0 : index
    %110 = vector.load %arg6[%c0_72, %c0_73] : memref<4x1xf32, #tpu.memory_space<vmem>>, vector<4x1xf32>
    %111 = vector.broadcast %110 : vector<4x1xf32> to vector<4x256xf32>
    %112 = arith.addf %109, %111 : vector<4x256xf32>
    %113 = arith.addf %112, %1 : vector<4x256xf32>
    %cst_74 = arith.constant 0.000000e+00 : f32
    %114 = vector.broadcast %cst_74 : f32 to vector<4x256xf32>
    %115 = arith.maximumf %113, %114 : vector<4x256xf32>
    %c0_75 = arith.constant 0 : index
    %c0_76 = arith.constant 0 : index
    %c0_77 = arith.constant 0 : index
    %116 = vector.load %arg7[%c0_75, %c0_76, %c0_77] : memref<1x4x256xf32, #tpu.memory_space<vmem>>, vector<1x4x256xf32>
    %117 = vector.shape_cast %116 : vector<1x4x256xf32> to vector<4x256xf32>
    %118 = vector.shape_cast %115 : vector<4x256xf32> to vector<1x4x256xf32>
    tpu.vector_store %arg7[%c0_75, %c0_76, %c0_77], %118 {strides = array<i32>} : memref<1x4x256xf32, #tpu.memory_space<vmem>>, vector<1x4x256xf32>,
    return
  }
  func.func @transform_0(%arg0: i32) -> (i32, i32, i32) {
    %c0_i32 = arith.constant 0 : i32
    %c0_i32_0 = arith.constant 0 : i32
    %c0_i32_1 = arith.constant 0 : i32
    return %arg0, %c0_i32, %c0_i32_0 : i32, i32, i32
  }
  func.func @transform_1(%arg0: i32) -> (i32, i32) {
    %c0_i32 = arith.constant 0 : i32
    %c0_i32_0 = arith.constant 0 : i32
    %c0_i32_1 = arith.constant 0 : i32
    return %c0_i32, %c0_i32_0 : i32, i32
  }
  func.func @transform_2(%arg0: i32) -> (i32, i32) {
    %c0_i32 = arith.constant 0 : i32
    %c0_i32_0 = arith.constant 0 : i32
    %c0_i32_1 = arith.constant 0 : i32
    return %c0_i32, %c0_i32_0 : i32, i32
  }
  func.func @transform_3(%arg0: i32) -> (i32, i32) {
    %c0_i32 = arith.constant 0 : i32
    %c0_i32_0 = arith.constant 0 : i32
    %c0_i32_1 = arith.constant 0 : i32
    return %c0_i32, %c0_i32_0 : i32, i32
  }
  func.func @transform_4(%arg0: i32) -> (i32, i32) {
    %c0_i32 = arith.constant 0 : i32
    %c0_i32_0 = arith.constant 0 : i32
    %c0_i32_1 = arith.constant 0 : i32
    return %c0_i32, %c0_i32_0 : i32, i32
  }
  func.func @transform_5(%arg0: i32) -> (i32, i32) {
    %c0_i32 = arith.constant 0 : i32
    %c0_i32_0 = arith.constant 0 : i32
    %c0_i32_1 = arith.constant 0 : i32
    return %c0_i32, %c0_i32_0 : i32, i32
  }
  func.func @transform_6(%arg0: i32) -> (i32, i32, i32) {
    %c0_i32 = arith.constant 0 : i32
    %c0_i32_0 = arith.constant 0 : i32
    %c0_i32_1 = arith.constant 0 : i32
    return %arg0, %c0_i32, %c0_i32_0 : i32, i32, i32
  }
}

</mosaic_0001>

<bundles_post_ra>
// kernel: tpu_custom_call.1
= control target key start
LH: loop header
LB: loop body
LE: loop exit
PB: predicated region body
PF: predicated region fallthrough
CT: control target
= control target key end

     0   :  { %11 = vsyncpa [#allocation5], 0  ;;  %s1651_s0 = inlined_call_operand.hbm [shape: f32[2,4,256], index: 0, kind: input, shape index: {}]   ;;  %s1652_s1 = inlined_call_operand.hbm [shape: s32[1,256], index: 1, kind: input, shape index: {}]   ;;  %s1653_s2 = inlined_call_operand.vmem [shape: f32[4,36], index: 2, kind: input, shape index: {}]   ;;  %s1654_s3 = inlined_call_operand.vmem [shape: f32[4,1], index: 3, kind: input, shape index: {}]   ;;  %s1655_s4 = inlined_call_operand.vmem [shape: f32[4,36], index: 4, kind: input, shape index: {}]   ;;  %s1656_s5 = inlined_call_operand.vmem [shape: f32[4,1], index: 5, kind: input, shape index: {}]   ;;  %s1657_s6 = inlined_call_operand.hbm [shape: f32[2,4,256], index: 6, kind: output, shape index: {}]  }
   0x1   :  { %13 = vsyncpa [#allocation5 + $0x1], 0 }
   0x2   :  { %14 = vsyncpa [#allocation8], 0 }
   0x3   :  { %15 = vsyncpa [#allocation6], 0 }
   0x4   :  { %17 = vsyncpa [#allocation6 + $0x1], 0  ;;  %s1289_s21 = smov 0   ;;  %s1291_s22 = smov 0  }
   0x5   :  { %s1293_s23 = smov 0   ;;  %s1295_s24 = smov 0  }
   0x6 LB: > { %s1310_s25 = sadd.s32 4294967295, %s1240_s24   ;;  %s944_s26 = sadd.s32 4294967294, %s1240_s24   ;;  %s1240_s24 = sphi %s1295_s24, %s1680_s24   ;;  %s1236_s23 = sphi %s1293_s23, %s1679_s23   ;;  %s1232_s22 = sphi %s1291_s22, %s1678_s22   ;;  %s1228_s21 = sphi %s1289_s21, %s1677_s21  }
   0x7   : > { %p43_p0 = scmp.ne.s32.totalorder %s1232_s22, %s1228_s21  ;;  %p44_p1 = scmp.eq.s32.totalorder %s1310_s25, 0 }
   0x8   : > { %p172_p2 = scmp.eq.s32.totalorder %s1310_s25, 1  ;;  %p178_p3 = scmp.eq.s32.totalorder %s944_s26, 1 }
   0x9   : > { %p1319_p4 = por %p44_p1, %p43_p0  ;;  %p945_p5 = scmp.ge.s32.totalorder %s1240_s24, 1 }
   0xa   : > { %p1324_p6 = por %p178_p3, %p43_p0  ;;  %p185_p7 = scmp.lt.s32.totalorder %s1240_s24, 3 }
   0xb   : > { %s197_s7 = sshll.u32 %s1652_s1, 4  ;;  %s1242_s9 = smov [#allocation7]   ;;  %s198_s7 = int_to_ptr.hbm [resolvable:$true] %s197_s7 }
   0xc   : > { %p1332_p8 = pnand %p945_p5, %p185_p7  ;;  %s199_s10 = sshll.u32 %s1242_s9, 4  ;;  %s200_s10 = int_to_ptr.vmem [resolvable:$true] %s199_s10 }
   0xd   : > { %s1342_s11 = sadd.s32 1, %s1240_s24   ;;  %s30_s12 = sadd.s32 1, %s1236_s23 }
   0xe   : > { %p978_p10 = pneg %p1332_p8  ;;  %s27_s13 = ssub.s32 %s1240_s24, %s1342_s11 }
   0xf   : > { %p28_p12 = scmp.eq.s32.totalorder %s27_s13, 0  ;;  %p37_p13 = scmp.ne.s32.totalorder %s1236_s23, %s1232_s22 }
  0x10   : > { %p979_p11 = pnand %p978_p10, %p44_p1  ;;  %p38_p0 = scmp.eq.s32.totalorder %s1240_s24, 0 }
  0x11   : > { %s1351_s14 = scalar_select %p28_p12, %s1236_s23, %s30_s12  }
  0x12   : > { %981 = dma.hbm_to_vmem [thread:$0]  (!%p979_p11), %s198_s7, 32, %s200_s10, [#allocation8]  }
  0x13   : > { %p1355_p3 = por %p172_p2, %p37_p13  ;;  %p991_p5 = scmp.lt.s32.totalorder %s1240_s24, 2 }
  0x14   : > { %s222_s16 = sand.u32 1, %s1236_s23   ;;  %s968_s17 = sshll.u32 %s1240_s24, 3 }
  0x15   : > { %p39_p7 = por %p38_p0, %p37_p13  ;;  %s948_s18 = sshll.u32 %s222_s16, 3 }
  0x16   : > { %s231_s26 = scalar_lea.hbm %s1651_s0, %s968_s17  ;;  %s226_s30 = scalar_lea.vmem [#allocation4], %s948_s18 }
  0x17   : > { %s233_s29 = sshll.u32 %s231_s26, 4  ;;  %s235_s7 = sshll.u32 %s226_s30, 4  ;;  %s234_s29 = int_to_ptr.hbm [resolvable:$true] %s233_s29  ;;  %s236_s7 = int_to_ptr.vmem [resolvable:$true] %s235_s7 }
  0x18   : > { %p1365_p10 = pnand %p991_p5, %p39_p7  ;;  %s223_s10 = scalar_lea.sflag [#allocation5], %s222_s16 }
  0x19   : > { %s1140_s12 = sshra.s32 %s234_s29, 4  ;;  %s1147_s18 = scalar_lea.hbm %s1651_s0, 16  ;;  %s1141_s12 = int_to_ptr.hbm [resolvable:$true] %s1140_s12 }
  0x1a   : > { %s1142_s13 = scalar_lea.hbm %s1141_s12, 8  ;;  %p1144_p11 = pneg %p1365_p10 }
  0x1b   : > { %p1143_p2 = scmp.ne.s32.totalorder %s1141_s12, %s1142_s13  ;;  %p1148_p0 = scmp.lt.s32.totalorder %s1141_s12, %s1651_s0 }
  0x1c   : > { %p1149_p5 = scmp.lt.s32.totalorder %s1147_s18, %s1142_s13 }
  0x1d   : > { %p1145_p12 = pnand %p1144_p11, %p1143_p2 }
  0x1e   : > { %p1150_p7 = por %p1149_p5, %p1148_p0 }
  0x1f   : > { %p1146_p13 = pneg %p1145_p12 }
  0x21   : > { %p1151_p9 = pnand %p1150_p7, %p1146_p13 }
  0x23   : > { %1154 = shalt.err (!%p1151_p9)
}
  0x24   : > { %985 = dma.hbm_to_vmem [thread:$0]  (!%p1365_p10), %s234_s29, 128, %s236_s7, %s223_s10  }
  0x25   : > { %244 = sbr.rel (%p1332_p8) target bundleno = 972 (0x3cc), region = 44  ;;  %s1382_s16 = sand.u32 (!%p1332_p8), 1, %s1232_s22  }
  0x26   : > { %s952_s30 = sshll.u32 (!%p1332_p8), %s1382_s16, 3  ;;  %s247_s17 = scalar_lea.sflag (!%p1332_p8), [#allocation5], %s1382_s16 }
  0x27   : > { %s250_s12 = scalar_lea.vmem (!%p1332_p8), [#allocation4], %s952_s30 }
  0x2a   : > { %1215 = dma.done.wait (%p1319_p4), %s247_s17, 128  }
  0x2b   : > { %1217 = vsyncadd (%p1319_p4), %s247_s17, 4294967168 }
  0x2c   : > { %1219 = dma.done.wait (%p44_p1), [#allocation8], 32  }
  0x2d   : > { %1221 = vsyncadd (%p44_p1), [#allocation8], 4294967264  ;;  %vm288_vm0 = vcmask 273408   ;;  %v1243_v0 = vmov 0.0   ;;  %v1396_v1 = vld [vmem:[%s250_s12] sm:$0xff]  ;;  %s1244_s8 = smov 17  }
  0x2e   : > { %287 = vst [vmem:[#allocation2] sm:$0xff] %v1243_v0  ;;  %291 = vrot.lane.b32.xlu0 %v1396_v1, %s1244_s8  ;;  %v1245_v2 = vmov 0   ;;  %vm298_vm1 = vcmask 1043592   ;;  %vm299_vm2 = vcmask 1047556   ;;  %vm294_vm3 = vcmask 138240   ;;  %s1246_s27 = smov 126  }
  0x2f   : > { %289 = vst.msk [vmem:[#allocation2 + $0x8] sm:$0xf] %vm288_vm0, %v1243_v0  ;;  %1073 = vset.pattern.permute.xlu0 %v1245_v2  ;;  %1109 = vset.pattern.permute.xlu2 %v1245_v2  ;;  %vm302_vm4 = vcmask 134144   ;;  %vm1402_vm5 = vmor %vm299_vm2, %vm298_vm1  ;;  %s1247_s29 = smov 112   ;;  %s1248_s7 = smov 110   ;;  %vm434_vm7 = vcmask 769024  }
  0x30   : > { %573 = vst [vmem:[#allocation3] sm:$0xff] %v1243_v0  ;;  %s1249_s9 = smov 96   ;;  %s1250_s10 = smov 94   ;;  %v286_v51 = vld [vmem:[#allocation7] sm:$0x3]  ;;  %vm506_vm9 = vcmask 1043456  }
  0x31   : > { %574 = vst.msk [vmem:[#allocation3 + $0x8] sm:$0xf] %vm288_vm0, %v1243_v0  ;;  %s1251_s13 = smov 111   ;;  %s1252_s19 = smov 95   ;;  %vm322_vm6 = vcmp.le.s32.totalorder %v286_v51, 14  ;;  %vm306_vm11 = vcmp.ge.s32.totalorder %v286_v51, 1 }
  0x32   : > { %s1253_s18 = smov 127   ;;  %v323_v54 = vsel %vm322_vm6, 1, %v1245_v2  ;;  %vm365_vm12 = vcmask 916480   ;;  %vm411_vm13 = vcmask 785408   ;;  %vm388_vm14 = vcmask 900096  }
  0x33   : > { %v324_v55 = vperm.slane %v323_v54, 0  ;;  %v325_v56 = vperm.slane %v323_v54, 1  ;;  %vm342_vm0 = vcmask 1031168   ;;  %vm1658_vm2 = vcmask 908288  }
  0x34   : > { %vm501_vm6 = vcmask 777216  }
  0x35   : > { %vm1448_vm8 = vcmp.eq.s32.totalorder %v324_v55, 1  ;;  %vm1456_vm10 = vcmp.eq.s32.totalorder %v325_v56, 1 }
  0xa0   : > { %v292_v3 = vpop.permute.xlu0 %291 }
  0xa1   : > { %v293_v5 = vrot.slane %v292_v3, 4 }
  0xa3   : > { %v295_v6 = vsel %vm294_vm3, %v293_v5, %v292_v3  ;;  %303 = vst.msk [vmem:[#allocation2 + $0x8] sm:$0xf] %vm302_vm4, %v293_v5  ;;  %v515_v5 = vld [vmem:[%s1654_s3] sm:$0xf] }
  0xa4   : > { %301 = vst.msk [vmem:[#allocation2] sm:$0xff] %vm1402_vm5, %v295_v6  ;;  %v307_v6 = vsel %vm306_vm11, 1, %v1245_v2  ;;  %vm454_vm11 = vcmask 1039360  }
  0xaa   : > { %v321_v7 = vld [vmem:[#allocation2 + $0x8] sm:$0xf] }
  0xab   : > { %v1410_v8 = vld [vmem:[#allocation2] sm:$0xff]  ;;  %332 = vst [vmem:[#allocation1 + $0x10] ss:$2 sm:$0xff] %v321_v7  ;;  %v350_v12 = vld [vmem:[#allocation2 + $0x8] sm:$0xf] }
  0xac   : > { %313 = vst [vmem:[#allocation1] ss:$2 sm:$0xff] %v1410_v8  ;;  %v373_v13 = vld [vmem:[#allocation2 + $0x8] sm:$0xf] }
  0xad   : > { %v396_v18 = vld [vmem:[#allocation2 + $0x8] sm:$0xf] }
  0xae   : > { %v419_v23 = vld [vmem:[#allocation2 + $0x8] sm:$0xf] }
  0xb2   : > { %v335_v9 = vld.sshfl [vmem:[#allocation1 + $0x10] sm:$0xff pattern:$0x75316420] }
  0xb3   : > { %v1413_v10 = vld.sshfl [vmem:[#allocation1] sm:$0xff pattern:$0x75316420]  ;;  %v1415_v11 = vld.sshfl [vmem:[#allocation1 + $0x8] sm:$0xff pattern:$0x75316420] }
  0xb4   : > { %330 = vst [vmem:[#allocation1] ss:$2 sm:$0xff] %v1410_v8 }
  0xb5   : > { %355 = vst [vmem:[#allocation1 + $0x10] ss:$2 sm:$0xff] %v350_v12 }
  0xbb   : > { %v1418_v14 = vld.sshfl [vmem:[#allocation1] sm:$0xff pattern:$0x75316420]  ;;  %v334_v15 = vld.sshfl [vmem:[#allocation1 + $0x8] sm:$0xff pattern:$0x75316420] }
  0xbc   : > { %353 = vst [vmem:[#allocation1] ss:$2 sm:$0xff] %v1410_v8  ;;  %v358_v16 = vld.sshfl [vmem:[#allocation1 + $0x10] sm:$0xff pattern:$0x75316420]  ;;  %v1038_v17 = vpack.i.bf16 %v335_v9, %v334_v15 }
  0xbd   : > { %378 = vst [vmem:[#allocation1 + $0x10] ss:$2 sm:$0xff] %v373_v13 }
  0xbe   : > { %1039 = vrot.lane.b32.xlu0 %v1038_v17, %s1246_s27 }
  0xc3   : > { %v356_v19 = vld.sshfl [vmem:[#allocation1] sm:$0xff pattern:$0x75316420]  ;;  %v357_v20 = vld.sshfl [vmem:[#allocation1 + $0x8] sm:$0xff pattern:$0x75316420] }
  0xc4   : > { %376 = vst [vmem:[#allocation1] ss:$2 sm:$0xff] %v1410_v8  ;;  %v381_v21 = vld.sshfl [vmem:[#allocation1 + $0x10] sm:$0xff pattern:$0x75316420]  ;;  %v1043_v22 = vpack.i.bf16 %v358_v16, %v357_v20 }
  0xc5   : > { %401 = vst [vmem:[#allocation1 + $0x10] ss:$2 sm:$0xff] %v396_v18 }
  0xc6   : > { %1044 = vrot.lane.b32.xlu1 %v1043_v22, %s1247_s29 }
  0xcb   : > { %v380_v24 = vld.sshfl [vmem:[#allocation1 + $0x8] sm:$0xff pattern:$0x75316420]  ;;  %v379_v25 = vld.sshfl [vmem:[#allocation1] sm:$0xff pattern:$0x75316420] }
  0xcc   : > { %382 = vrot.lane.b32.xlu2 %v379_v25, %s1248_s7  ;;  %399 = vst [vmem:[#allocation1] ss:$2 sm:$0xff] %v1410_v8  ;;  %v404_v26 = vld.sshfl [vmem:[#allocation1 + $0x10] sm:$0xff pattern:$0x75316420]  ;;  %v1048_v29 = vpack.i.bf16 %v381_v21, %v380_v24  ;;  %v308_v21 = vperm.slane %v307_v6, 0 }
  0xcd   : > { %424 = vst [vmem:[#allocation1 + $0x10] ss:$2 sm:$0xff] %v419_v23 }
  0xce   : > { %359 = vrot.lane.b32.xlu1 %v356_v19, %s1247_s29  ;;  %vm1480_vm1 = vcmp.eq.s32.totalorder %v308_v21, 1 }
  0xd3   : > { %v402_v27 = vld.sshfl [vmem:[#allocation1] sm:$0xff pattern:$0x75316420]  ;;  %v403_v28 = vld.sshfl [vmem:[#allocation1 + $0x8] sm:$0xff pattern:$0x75316420] }
  0xd4   : > { %405 = vrot.lane.b32.xlu0 %v402_v27, %s1249_s9  ;;  %v1053_v30 = vpack.i.bf16 %v404_v26, %v403_v28  ;;  %422 = vst [vmem:[#allocation1] ss:$2 sm:$0xff] %v1410_v8  ;;  %v427_v31 = vld.sshfl [vmem:[#allocation1 + $0x10] sm:$0xff pattern:$0x75316420] }
  0xd5   : > { %444 = vst [vmem:[#allocation1 + $0x11] ss:$2 sm:$0xff] %v321_v7 }
  0xd6   : > { %1049 = vrot.lane.b32.xlu1 %v1048_v29, %s1248_s7  ;;  %1054 = vrot.lane.b32.xlu2 %v1053_v30, %s1249_s9 }
  0xdb   : > { %v426_v32 = vld.sshfl [vmem:[#allocation1 + $0x8] sm:$0xff pattern:$0x75316420]  ;;  %v425_v33 = vld.sshfl [vmem:[#allocation1] sm:$0xff pattern:$0x75316420] }
  0xdc   : > { %430 = vrot.lane.b32.xlu0 %v426_v32, %s1250_s10  ;;  %442 = vst [vmem:[#allocation1 + $0x1] ss:$2 sm:$0xff] %v1410_v8  ;;  %v447_v34 = vld.sshfl [vmem:[#allocation1 + $0x10] sm:$0xff pattern:$0x75316420] }
  0xdd   : > { %467 = vst [vmem:[#allocation1 + $0x10] ss:$2 sm:$0xff] %v373_v13  ;;  %v309_v13 = vperm.slane %v307_v6, 1 }
  0xde   : > { %432 = vrot.lane.b32.xlu1 %v427_v31, %s1250_s10  ;;  %428 = vrot.lane.b32.xlu2 %v425_v33, %s1250_s10 }
  0xdf   : > { %vm1471_vm15 = vcmp.eq.s32.totalorder %v309_v13, 1 }
  0xe3   : > { %v445_v35 = vld.sshfl [vmem:[#allocation1] sm:$0xff pattern:$0x75316420]  ;;  %v446_v36 = vld.sshfl [vmem:[#allocation1 + $0x8] sm:$0xff pattern:$0x75316420] }
  0xe4   : > { %465 = vst [vmem:[#allocation1] ss:$2 sm:$0xff] %v1410_v8  ;;  %v470_v37 = vld.sshfl [vmem:[#allocation1 + $0x10] sm:$0xff pattern:$0x75316420]  ;;  %v1068_v44 = vpack.i.bf16 %v447_v34, %v446_v36 }
  0xe5   : > { %491 = vst [vmem:[#allocation1 + $0x11] ss:$2 sm:$0xff] %v419_v23 }
  0xeb   : > { %v468_v38 = vld.sshfl [vmem:[#allocation1] sm:$0xff pattern:$0x75316420]  ;;  %v469_v39 = vld.sshfl [vmem:[#allocation1 + $0x8] sm:$0xff pattern:$0x75316420] }
  0xec   : > { %471 = vrot.lane.b32.xlu2 %v468_v38, %s1251_s13  ;;  %v1058_v40 = vpack.i.bf16 %v470_v37, %v469_v39  ;;  %489 = vst [vmem:[#allocation1 + $0x1] ss:$2 sm:$0xff] %v1410_v8  ;;  %v494_v41 = vld.sshfl [vmem:[#allocation1 + $0x10] sm:$0xff pattern:$0x75316420] }
  0xee   : > { %1059 = vrot.lane.b32.xlu1 %v1058_v40, %s1251_s13 }
  0xf3   : > { %v492_v42 = vld.sshfl [vmem:[#allocation1] sm:$0xff pattern:$0x75316420]  ;;  %v493_v43 = vld.sshfl [vmem:[#allocation1 + $0x8] sm:$0xff pattern:$0x75316420] }
  0xf4   : > { %495 = vrot.lane.b32.xlu2 %v492_v42, %s1252_s19  ;;  %v1063_v45 = vpack.i.bf16 %v494_v41, %v493_v43 }
  0xf6   : > { %1069 = vrot.lane.b32.xlu1 %v1068_v44, %s1253_s18  ;;  %1064 = vrot.lane.b32.xlu0 %v1063_v45, %s1252_s19 }
  0xfc   : > { %448 = vrot.lane.b32.xlu2 %v445_v35, %s1253_s18 }
  0xfe   : > { %336 = vrot.lane.b32.xlu0 %v1418_v14, %s1246_s27 }
 0x106   : > { %518 = vperm.xlu0 %1073, %v515_v5  }
 0x126   : > { %v383_v47 = vpop.permute.xlu2 %382 }
 0x130   : > { %v1445_v48 = vpop.permute.xlu0 %1039  ;;  %v1055_v50 = vpop.permute.xlu2 %1054 }
 0x131   : > { %v1057_v14 = vunpack.i.h.bf16 %v1055_v50  ;;  %v1056_v15 = vunpack.i.l.bf16 %v1055_v50  ;;  %v1042_v19 = vunpack.i.h.bf16 %v1445_v48  ;;  %v1041_v20 = vunpack.i.l.bf16 %v1445_v48 }
 0x133   : > { %v413_v22 = vsel %vm411_vm13, %v1056_v15, %v1057_v14  ;;  %v344_v31 = vsel %vm342_vm0, %v1041_v20, %v1042_v19 }
 0x134   : > { %v417_v35 = vsel %vm1471_vm15, %v413_v22, 0.0  ;;  %v348_v55 = vsel %vm1456_vm10, %v344_v31, 0.0 }
 0x138   : > { %v1045_v46 = vpop.permute.xlu1 %1044  ;;  %v429_v57 = vpop.permute.xlu2 %428 }
 0x139   : > { %v1047_v8 = vunpack.i.h.bf16 %v1045_v46  ;;  %v1046_v9 = vunpack.i.l.bf16 %v1045_v46 }
 0x13b   : > { %v367_v18 = vsel %vm365_vm12, %v1046_v9, %v1047_v8 }
 0x13c   : > { %v371_v23 = vsel %vm1471_vm15, %v367_v18, 0.0 }
 0x13d   : > { %v462_v36 = vrot.slane %v371_v23, 4 }
 0x140   : > { %v360_v49 = vpop.permute.xlu1 %359 }
 0x141   : > { %v366_v32 = vsel %vm365_vm12, %v360_v49, %v1046_v9 }
 0x146   : > { %v406_v52 = vpop.permute.xlu0 %405  ;;  %v472_v7 = vpop.permute.xlu2 %471 }
 0x147   : > { %v412_v29 = vsel %vm411_vm13, %v406_v52, %v1056_v15  ;;  %v370_v52 = vsel %vm1480_vm1, %v366_v32, 0.0 }
 0x148   : > { %v1050_v53 = vpop.permute.xlu1 %1049  ;;  %v416_v41 = vsel %vm1480_vm1, %v412_v29, 0.0 }
 0x149   : > { %v1052_v16 = vunpack.i.h.bf16 %v1050_v53  ;;  %v1051_v17 = vunpack.i.l.bf16 %v1050_v53 }
 0x14b   : > { %v389_v26 = vsel %vm388_vm14, %v383_v47, %v1051_v17  ;;  %v390_v27 = vsel %vm388_vm14, %v1051_v17, %v1052_v16 }
 0x14c   : > { %v393_v39 = vsel %vm1448_vm8, %v389_v26, 0.0  ;;  %v394_v40 = vsel %vm1456_vm10, %v390_v27, 0.0 }
 0x14d   : > { %v484_v50 = vrot.slane %v393_v39, 4  ;;  %v485_v51 = vrot.slane %v394_v40, 4 }
 0x14e   : > { %v431_v58 = vpop.permute.xlu0 %430  ;;  %v496_v30 = vpop.permute.xlu2 %495 }
 0x14f   : > { %v435_v60 = vsel %vm434_vm7, %v429_v57, %v431_v58 }
 0x150   : > { %v433_v61 = vpop.permute.xlu1 %432  ;;  %v439_v62 = vsel %vm1448_vm8, %v435_v60, 0.0  ;;  %v461_v60 = vrot.slane %v370_v52, 4 }
 0x151   : > { %955 = vmatpush.msk.msra.mxu0 %vm506_vm9, %v439_v62  ;;  %v436_v0 = vsel %vm434_vm7, %v431_v58, %v433_v61  ;;  %v510_v58 = vsel %vm506_vm9, %v348_v55, %v462_v36 }
 0x152   : > { %v440_v3 = vsel %vm1456_vm10, %v436_v0, 0.0  ;;  %v319_v0 = vsel %vm1471_vm15, %v1415_v11, 0.0  ;;  %v318_v11 = vsel %vm1480_vm1, %v1413_v10, 0.0 }
 0x153   : > { %957 = vmatpush.msk.msra.mxu1 %vm506_vm9, %v440_v3  ;;  %v304_v3 = vld [vmem:[%s1653_s2] sm:$0xf] }
 0x156   : > { %v449_v61 = vpop.permute.xlu2 %448 }
 0x160   : > { %v1060_v12 = vpop.permute.xlu1 %1059 }
 0x161   : > { %v1062_v24 = vunpack.i.h.bf16 %v1060_v12  ;;  %v1061_v25 = vunpack.i.l.bf16 %v1060_v12 }
 0x163   : > { %v478_v42 = vsel %vm1658_vm2, %v472_v7, %v1061_v25  ;;  %v479_v43 = vsel %vm1658_vm2, %v1061_v25, %v1062_v24  ;;  %vm521_vm2 = vcmask 293888  }
 0x164   : > { %v511_v53 = vsel %vm506_vm9, %v478_v42, %v484_v50  ;;  %v512_v54 = vsel %vm506_vm9, %v479_v43, %v485_v51 }
 0x168   : > { %v1070_v33 = vpop.permute.xlu1 %1069  ;;  %v1065_v34 = vpop.permute.xlu0 %1064 }
 0x169   : > { %v1067_v37 = vunpack.i.h.bf16 %v1065_v34  ;;  %v1066_v38 = vunpack.i.l.bf16 %v1065_v34  ;;  %v1072_v44 = vunpack.i.h.bf16 %v1070_v33  ;;  %v1071_v45 = vunpack.i.l.bf16 %v1070_v33 }
 0x16b   : > { %v502_v46 = vsel %vm501_vm6, %v496_v30, %v1066_v38  ;;  %v503_v47 = vsel %vm501_vm6, %v1066_v38, %v1067_v37  ;;  %v456_v56 = vsel %vm454_vm11, %v1071_v45, %v1072_v44  ;;  %v455_v7 = vsel %vm454_vm11, %v449_v61, %v1071_v45 }
 0x16c   : > { %v513_v48 = vsel %vm506_vm9, %v416_v41, %v502_v46  ;;  %v514_v49 = vsel %vm506_vm9, %v417_v35, %v503_v47  ;;  %v508_v5 = vsel %vm506_vm9, %v319_v0, %v456_v56  ;;  %v507_v9 = vsel %vm506_vm9, %v318_v11, %v455_v7 }
 0x16d   : > { %543 = vmatpush.msra.mxu0 %v513_v48  ;;  %563 = vmatpush.msra.mxu1 %v514_v49 }
 0x16f   : > { %544 = vmatpush.msra.mxu0 %v511_v53  ;;  %564 = vmatpush.msra.mxu1 %v512_v54 }
 0x170   : > { %v337_v57 = vpop.permute.xlu0 %336 }
 0x171   : > { %v343_v62 = vsel %vm342_vm0, %v337_v57, %v1041_v20  ;;  %565 = vmatpush.msra.mxu1 %v510_v58 }
 0x172   : > { %v347_v6 = vsel %vm1448_vm8, %v343_v62, 0.0 }
 0x173   : > { %566 = vmatpush.msra.mxu1 %v508_v5  ;;  %v509_v8 = vsel %vm506_vm9, %v347_v6, %v461_v60 }
 0x174   : > { %545 = vmatpush.msra.mxu0 %v509_v8  ;;  %958 = vmatmul.msk.f32.vlgmr.msra.gmra.mxu1 %vm521_vm2, %v304_v3 }
 0x176   : > { %546 = vmatpush.msra.mxu0 %v507_v9 }
 0x177   : > { %956 = vmatmul.msk.f32.vlgmr.msra.gmra.mxu0 %vm521_vm2, %v304_v3 }
 0x178   : > { %v519_v12 = vpop.permute.xlu0 %518 }
 0x1f1   : > { %v568_v13 = vpop.f32.mrf.mxu1 }
 0x1f2   : > { %v569_v14 = vadd.f32 %v568_v13, %v519_v12 }
 0x1f4   : > { %v572_v15 = vmax.f32 %v569_v14, 0.0  ;;  %v548_v16 = vpop.f32.mrf.mxu0 }
 0x1f5   : > { %v549_v17 = vadd.f32 %v548_v16, %v519_v12 }
 0x1f6   : > { %v577_v18 = vrot.slane %v572_v15, 4 }
 0x1f7   : > { %v571_v19 = vmax.f32 %v549_v17, 0.0 }
 0x1f9   : > { %v578_v20 = vsel %vm506_vm9, %v571_v19, %v577_v18 }
 0x1fa   : > { %579 = vrot.lane.b32.xlu1 %v578_v20, %s1244_s8 }
 0x26c   : > { %v580_v21 = vpop.permute.xlu1 %579 }
 0x26d   : > { %v581_v22 = vrot.slane %v580_v21, 4 }
 0x26f   : > { %v582_v10 = vsel %vm294_vm3, %v581_v22, %v580_v21  ;;  %586 = vst.msk [vmem:[#allocation3 + $0x8] sm:$0xf] %vm302_vm4, %v581_v22  ;;  %vm1674_vm3 = vcmask 908288  }
 0x270   : > { %585 = vst.msk [vmem:[#allocation3] sm:$0xff] %vm1402_vm5, %v582_v10  ;;  %v777_v10 = vld [vmem:[%s1656_s5] sm:$0xf]  ;;  %vm1675_vm4 = vmmov %vm1674_vm3 }
 0x276   : > { %v598_v23 = vld [vmem:[#allocation3 + $0x8] sm:$0xf] }
 0x277   : > { %v588_v24 = vld [vmem:[#allocation3] sm:$0xff]  ;;  %603 = vst [vmem:[#allocation1 + $0x10] ss:$2 sm:$0xff] %v598_v23  ;;  %v620_v25 = vld [vmem:[#allocation3 + $0x8] sm:$0xf] }
 0x278   : > { %590 = vst [vmem:[#allocation1] ss:$2 sm:$0xff] %v588_v24  ;;  %v642_v30 = vld [vmem:[#allocation3 + $0x8] sm:$0xf] }
 0x279   : > { %v664_v4 = vld [vmem:[#allocation3 + $0x8] sm:$0xf] }
 0x27a   : > { %v686_v39 = vld [vmem:[#allocation3 + $0x8] sm:$0xf] }
 0x27e   : > { %v606_v29 = vld.sshfl [vmem:[#allocation1 + $0x10] sm:$0xff pattern:$0x75316420] }
 0x27f   : > { %v1533_v26 = vld.sshfl [vmem:[#allocation1] sm:$0xff pattern:$0x75316420]  ;;  %v1535_v27 = vld.sshfl [vmem:[#allocation1 + $0x8] sm:$0xff pattern:$0x75316420] }
 0x280   : > { %601 = vst [vmem:[#allocation1] ss:$2 sm:$0xff] %v588_v24  ;;  %v595_v2 = vsel %vm1480_vm1, %v1533_v26, 0.0 }
 0x281   : > { %625 = vst [vmem:[#allocation1 + $0x10] ss:$2 sm:$0xff] %v620_v25 }
 0x287   : > { %v604_v31 = vld.sshfl [vmem:[#allocation1] sm:$0xff pattern:$0x75316420]  ;;  %v605_v32 = vld.sshfl [vmem:[#allocation1 + $0x8] sm:$0xff pattern:$0x75316420] }
 0x288   : > { %623 = vst [vmem:[#allocation1] ss:$2 sm:$0xff] %v588_v24  ;;  %v1074_v33 = vpack.i.bf16 %v606_v29, %v605_v32  ;;  %v628_v34 = vld.sshfl [vmem:[#allocation1 + $0x10] sm:$0xff pattern:$0x75316420] }
 0x289   : > { %647 = vst [vmem:[#allocation1 + $0x10] ss:$2 sm:$0xff] %v642_v30 }
 0x28a   : > { %1075 = vrot.lane.b32.xlu2 %v1074_v33, %s1246_s27 }
 0x28f   : > { %v626_v35 = vld.sshfl [vmem:[#allocation1] sm:$0xff pattern:$0x75316420]  ;;  %v627_v36 = vld.sshfl [vmem:[#allocation1 + $0x8] sm:$0xff pattern:$0x75316420] }
 0x290   : > { %645 = vst [vmem:[#allocation1] ss:$2 sm:$0xff] %v588_v24  ;;  %v1079_v37 = vpack.i.bf16 %v628_v34, %v627_v36  ;;  %v650_v38 = vld.sshfl [vmem:[#allocation1 + $0x10] sm:$0xff pattern:$0x75316420] }
 0x291   : > { %669 = vst [vmem:[#allocation1 + $0x10] ss:$2 sm:$0xff] %v664_v4 }
 0x292   : > { %1080 = vrot.lane.b32.xlu0 %v1079_v37, %s1247_s29 }
 0x297   : > { %v648_v40 = vld.sshfl [vmem:[#allocation1] sm:$0xff pattern:$0x75316420]  ;;  %v649_v41 = vld.sshfl [vmem:[#allocation1 + $0x8] sm:$0xff pattern:$0x75316420] }
 0x298   : > { %667 = vst [vmem:[#allocation1] ss:$2 sm:$0xff] %v588_v24  ;;  %651 = vrot.lane.b32.xlu1 %v648_v40, %s1248_s7  ;;  %v1084_v42 = vpack.i.bf16 %v650_v38, %v649_v41  ;;  %v672_v43 = vld.sshfl [vmem:[#allocation1 + $0x10] sm:$0xff pattern:$0x75316420] }
 0x299   : > { %691 = vst [vmem:[#allocation1 + $0x10] ss:$2 sm:$0xff] %v686_v39 }
 0x29a   : > { %629 = vrot.lane.b32.xlu0 %v626_v35, %s1247_s29  ;;  %1085 = vrot.lane.b32.xlu2 %v1084_v42, %s1248_s7 }
 0x29f   : > { %v670_v44 = vld.sshfl [vmem:[#allocation1] sm:$0xff pattern:$0x75316420]  ;;  %v671_v45 = vld.sshfl [vmem:[#allocation1 + $0x8] sm:$0xff pattern:$0x75316420] }
 0x2a0   : > { %689 = vst [vmem:[#allocation1] ss:$2 sm:$0xff] %v588_v24  ;;  %v694_v46 = vld.sshfl [vmem:[#allocation1 + $0x10] sm:$0xff pattern:$0x75316420]  ;;  %v1089_v47 = vpack.i.bf16 %v672_v43, %v671_v45 }
 0x2a1   : > { %699 = vrot.lane.b32.xlu1 %v694_v46, %s1250_s10  ;;  %710 = vst [vmem:[#allocation1 + $0x11] ss:$2 sm:$0xff] %v598_v23 }
 0x2a2   : > { %1090 = vrot.lane.b32.xlu0 %v1089_v47, %s1249_s9  ;;  %673 = vrot.lane.b32.xlu2 %v670_v44, %s1249_s9  ;;  %s969_s9 = sshll.u32 %s1310_s25, 3  ;;  %s848_s25 = scalar_lea.sflag [#allocation6], %s1382_s16 }
 0x2a7   : > { %v692_v48 = vld.sshfl [vmem:[#allocation1] sm:$0xff pattern:$0x75316420]  ;;  %v693_v49 = vld.sshfl [vmem:[#allocation1 + $0x8] sm:$0xff pattern:$0x75316420] }
 0x2a8   : > { %708 = vst [vmem:[#allocation1 + $0x1] ss:$2 sm:$0xff] %v588_v24  ;;  %v713_v50 = vld.sshfl [vmem:[#allocation1 + $0x10] sm:$0xff pattern:$0x75316420] }
 0x2a9   : > { %695 = vrot.lane.b32.xlu1 %v692_v48, %s1250_s10  ;;  %732 = vst [vmem:[#allocation1 + $0x10] ss:$2 sm:$0xff] %v642_v30 }
 0x2aa   : > { %697 = vrot.lane.b32.xlu2 %v693_v49, %s1250_s10 }
 0x2af   : > { %v711_v51 = vld.sshfl [vmem:[#allocation1] sm:$0xff pattern:$0x75316420]  ;;  %v712_v52 = vld.sshfl [vmem:[#allocation1 + $0x8] sm:$0xff pattern:$0x75316420] }
 0x2b0   : > { %730 = vst [vmem:[#allocation1] ss:$2 sm:$0xff] %v588_v24  ;;  %v735_v53 = vld.sshfl [vmem:[#allocation1 + $0x10] sm:$0xff pattern:$0x75316420]  ;;  %v1104_v61 = vpack.i.bf16 %v713_v50, %v712_v52 }
 0x2b1   : > { %755 = vst [vmem:[#allocation1 + $0x11] ss:$2 sm:$0xff] %v686_v39 }
 0x2b7   : > { %v733_v54 = vld.sshfl [vmem:[#allocation1] sm:$0xff pattern:$0x75316420]  ;;  %v734_v55 = vld.sshfl [vmem:[#allocation1 + $0x8] sm:$0xff pattern:$0x75316420] }
 0x2b8   : > { %736 = vrot.lane.b32.xlu1 %v733_v54, %s1251_s13  ;;  %v1094_v56 = vpack.i.bf16 %v735_v53, %v734_v55  ;;  %753 = vst [vmem:[#allocation1 + $0x1] ss:$2 sm:$0xff] %v588_v24  ;;  %v758_v57 = vld.sshfl [vmem:[#allocation1 + $0x10] sm:$0xff pattern:$0x75316420] }
 0x2ba   : > { %1095 = vrot.lane.b32.xlu0 %v1094_v56, %s1251_s13 }
 0x2bf   : > { %v756_v58 = vld.sshfl [vmem:[#allocation1] sm:$0xff pattern:$0x75316420]  ;;  %v757_v60 = vld.sshfl [vmem:[#allocation1 + $0x8] sm:$0xff pattern:$0x75316420] }
 0x2c0   : > { %759 = vrot.lane.b32.xlu1 %v756_v58, %s1252_s19  ;;  %v1099_v62 = vpack.i.bf16 %v758_v57, %v757_v60  ;;  %832 = vst [vmem:[#allocation1] ss:$2 sm:$0xff] %v1396_v1 }
 0x2c2   : > { %1105 = vrot.lane.b32.xlu0 %v1104_v61, %s1253_s18  ;;  %1100 = vrot.lane.b32.xlu2 %v1099_v62, %s1252_s19  ;;  %s859_s19 = scalar_lea.hbm %s1657_s6, %s969_s9 }
 0x2c3   : > { %s863_s26 = sshll.u32 %s859_s19, 4  ;;  %s864_s26 = int_to_ptr.hbm [resolvable:$true] %s863_s26 }
 0x2c4   : > { %s1184_s17 = sshra.s32 %s864_s26, 4  ;;  %s1185_s17 = int_to_ptr.hbm [resolvable:$true] %s1184_s17 }
 0x2c5   : > { %s1186_s12 = scalar_lea.hbm %s1185_s17, 8  ;;  %p1191_p9 = scmp.lt.s32.totalorder %s1185_s17, %s1657_s6 }
 0x2c6   : > { %p1187_p1 = scmp.ne.s32.totalorder %s1185_s17, %s1186_s12 }
 0x2c8   : > { %714 = vrot.lane.b32.xlu1 %v711_v51, %s1253_s18  ;;  %s284_s18 = scalar_lea.vmem [#allocation9], %s952_s30  ;;  %p1188_p4 = pnand %p1187_p1, %p1355_p3 }
 0x2c9   : > { %s861_s20 = sshll.u32 %s284_s18, 4  ;;  %s1190_s30 = scalar_lea.hbm %s1657_s6, 16  ;;  %s862_s20 = int_to_ptr.vmem [resolvable:$true] %s861_s20 }
 0x2ca   : > { %607 = vrot.lane.b32.xlu2 %v604_v31, %s1246_s27  ;;  %p1189_p8 = pneg %p1188_p4  ;;  %p1192_p10 = scmp.lt.s32.totalorder %s1190_s30, %s1186_s12 }
 0x2cc   : > { %p1193_p2 = por %p1192_p10, %p1191_p9 }
 0x2ce   : > { %p1194_p11 = pnand %p1193_p2, %p1189_p8 }
 0x2d2   : > { %780 = vperm.xlu2 %1109, %v777_v10  }
 0x2e4   : > { %v1076_v0 = vpop.permute.xlu2 %1075 }
 0x2e5   : > { %v1078_v4 = vunpack.i.h.bf16 %v1076_v0  ;;  %v1077_v35 = vunpack.i.l.bf16 %v1076_v0 }
 0x2e7   : > { %v614_v44 = vsel %vm342_vm0, %v1077_v35, %v1078_v4 }
 0x2e8   : > { %v618_v52 = vsel %vm1456_vm10, %v614_v44, 0.0 }
 0x2f4   : > { %v1086_v3 = vpop.permute.xlu2 %1085 }
 0x2f5   : > { %v1088_v29 = vunpack.i.h.bf16 %v1086_v3  ;;  %v1087_v30 = vunpack.i.l.bf16 %v1086_v3 }
 0x2f7   : > { %v658_v33 = vsel %vm388_vm14, %v1087_v30, %v1088_v29 }
 0x2f8   : > { %v662_v37 = vsel %vm1456_vm10, %v658_v33, 0.0 }
 0x2f9   : > { %v749_v43 = vrot.slane %v662_v37, 4 }
 0x2fc   : > { %v674_v6 = vpop.permute.xlu2 %673 }
 0x304   : > { %v1081_v5 = vpop.permute.xlu0 %1080  ;;  %v698_v11 = vpop.permute.xlu2 %697 }
 0x305   : > { %v1083_v31 = vunpack.i.h.bf16 %v1081_v5  ;;  %v1082_v32 = vunpack.i.l.bf16 %v1081_v5 }
 0x307   : > { %v636_v34 = vsel %vm365_vm12, %v1082_v32, %v1083_v31 }
 0x308   : > { %v640_v38 = vsel %vm1471_vm15, %v636_v34, 0.0 }
 0x309   : > { %v727_v45 = vrot.slane %v640_v38, 4 }
 0x30a   : > { %v652_v7 = vpop.permute.xlu1 %651 }
 0x30b   : > { %v657_v42 = vsel %vm388_vm14, %v652_v7, %v1087_v30  ;;  %v772_v55 = vsel %vm506_vm9, %v618_v52, %v727_v45 }
 0x30c   : > { %v630_v8 = vpop.permute.xlu0 %629  ;;  %v661_v51 = vsel %vm1448_vm8, %v657_v42, 0.0 }
 0x30d   : > { %v635_v48 = vsel %vm365_vm12, %v630_v8, %v1082_v32  ;;  %v748_v61 = vrot.slane %v661_v51, 4  ;;  %v596_v8 = vsel %vm1471_vm15, %v1535_v27, 0.0 }
 0x30e   : > { %v639_v56 = vsel %vm1480_vm1, %v635_v48, 0.0 }
 0x313   : > { %v700_v9 = vpop.permute.xlu1 %699 }
 0x314   : > { %v702_v12 = vsel %vm434_vm7, %v698_v11, %v700_v9  ;;  %v1091_v13 = vpop.permute.xlu0 %1090  ;;  %v587_v9 = vld [vmem:[%s1655_s4] sm:$0xf] }
 0x315   : > { %v706_v1 = vsel %vm1456_vm10, %v702_v12, 0.0  ;;  %v1093_v14 = vunpack.i.h.bf16 %v1091_v13  ;;  %v1092_v15 = vunpack.i.l.bf16 %v1091_v13 }
 0x316   : > { %961 = vmatpush.msk.msra.mxu3 %vm506_vm9, %v706_v1 }
 0x317   : > { %v680_v19 = vsel %vm411_vm13, %v1092_v15, %v1093_v14  ;;  %v679_v50 = vsel %vm411_vm13, %v674_v6, %v1092_v15  ;;  %v726_v6 = vrot.slane %v639_v56, 4 }
 0x318   : > { %v684_v23 = vsel %vm1471_vm15, %v680_v19, 0.0  ;;  %v683_v58 = vsel %vm1480_vm1, %v679_v50, 0.0 }
 0x31b   : > { %v696_v16 = vpop.permute.xlu1 %695 }
 0x31c   : > { %v1101_v17 = vpop.permute.xlu2 %1100  ;;  %v701_v18 = vsel %vm434_vm7, %v696_v16, %v698_v11 }
 0x31d   : > { %v1103_v20 = vunpack.i.h.bf16 %v1101_v17  ;;  %v1102_v21 = vunpack.i.l.bf16 %v1101_v17  ;;  %v705_v22 = vsel %vm1448_vm8, %v701_v18, 0.0  ;;  %v834_v17 = vld.sshfl [vmem:[#allocation1 + $0x8] sm:$0xff pattern:$0x75316420] }
 0x31e   : > { %959 = vmatpush.msk.msra.mxu2 %vm506_vm9, %v705_v22 }
 0x31f   : > { %v766_v24 = vsel %vm501_vm6, %v1102_v21, %v1103_v20  ;;  %v833_v20 = vld.sshfl [vmem:[#allocation1] sm:$0xff pattern:$0x75316420] }
 0x320   : > { %v776_v25 = vsel %vm506_vm9, %v684_v23, %v766_v24 }
 0x321   : > { %824 = vmatpush.msra.mxu3 %v776_v25 }
 0x324   : > { %v608_v46 = vpop.permute.xlu2 %607 }
 0x325   : > { %v613_v53 = vsel %vm342_vm0, %v608_v46, %v1077_v35 }
 0x326   : > { %v617_v5 = vsel %vm1448_vm8, %v613_v53, 0.0 }
 0x327   : > { %v771_v12 = vsel %vm506_vm9, %v617_v5, %v726_v6 }
 0x32a   : > { %v737_v36 = vpop.permute.xlu1 %736 }
 0x32c   : > { %v1096_v39 = vpop.permute.xlu0 %1095  ;;  %v781_v14 = vpop.permute.xlu2 %780 }
 0x32d   : > { %v1098_v40 = vunpack.i.h.bf16 %v1096_v39  ;;  %v1097_v41 = vunpack.i.l.bf16 %v1096_v39 }
 0x32f   : > { %v743_v47 = vsel %vm1674_vm3, %v1097_v41, %v1098_v40  ;;  %v742_v60 = vsel %vm1675_vm4, %v737_v36, %v1097_v41 }
 0x330   : > { %v774_v49 = vsel %vm506_vm9, %v743_v47, %v749_v43  ;;  %v773_v7 = vsel %vm506_vm9, %v742_v60, %v748_v61 }
 0x331   : > { %825 = vmatpush.msra.mxu3 %v774_v49 }
 0x332   : > { %v760_v54 = vpop.permute.xlu1 %759 }
 0x333   : > { %v765_v57 = vsel %vm501_vm6, %v760_v54, %v1102_v21  ;;  %826 = vmatpush.msra.mxu3 %v772_v55 }
 0x334   : > { %v1106_v62 = vpop.permute.xlu0 %1105  ;;  %v775_v63 = vsel %vm506_vm9, %v683_v58, %v765_v57 }
 0x335   : > { %v1108_v0 = vunpack.i.h.bf16 %v1106_v62  ;;  %v1107_v3 = vunpack.i.l.bf16 %v1106_v62  ;;  %804 = vmatpush.msra.mxu2 %v775_v63 }
 0x337   : > { %805 = vmatpush.msra.mxu2 %v773_v7  ;;  %v721_v11 = vsel %vm454_vm11, %v1107_v3, %v1108_v0 }
 0x338   : > { %v770_v59 = vsel %vm506_vm9, %v596_v8, %v721_v11 }
 0x339   : > { %806 = vmatpush.msra.mxu2 %v771_v12  ;;  %827 = vmatpush.msra.mxu3 %v770_v59 }
 0x33a   : > { %962 = vmatmul.msk.f32.vlgmr.msra.gmra.mxu3 %vm521_vm2, %v587_v9  ;;  %v715_v13 = vpop.permute.xlu1 %714 }
 0x33b   : > { %v720_v1 = vsel %vm454_vm11, %v715_v13, %v1107_v3 }
 0x33c   : > { %v769_v27 = vsel %vm506_vm9, %v595_v2, %v720_v1 }
 0x33d   : > { %807 = vmatpush.msra.mxu2 %v769_v27 }
 0x33e   : > { %960 = vmatmul.msk.f32.vlgmr.msra.gmra.mxu2 %vm521_vm2, %v587_v9 }
 0x3bd   : > { %v829_v15 = vpop.f32.mrf.mxu3 }
 0x3be   : > { %v830_v16 = vadd.f32 %v829_v15, %v781_v14 }
 0x3c0   : > { %v838_v18 = vadd.f32 %v834_v17, %v830_v16 }
 0x3c1   : > { %v809_v19 = vpop.f32.mrf.mxu2 }
 0x3c2   : > { %v840_v28 = vmax.f32 %v838_v18, 0.0  ;;  %v810_v26 = vadd.f32 %v809_v19, %v781_v14 }
 0x3c4   : > { %v837_v21 = vadd.f32 %v833_v20, %v810_v26  ;;  %v843_v22 = vrot.slane %v840_v28, 4 }
 0x3c6   : > { %v839_v10 = vmax.f32 %v837_v21, 0.0 }
 0x3c8   : > { %v844_v23 = vsel %vm506_vm9, %v839_v10, %v843_v22 }
 0x3c9   : > { %846 = vst [vmem:[%s284_s18] sm:$0xff] %v844_v23 }
 0x3ca   : > { %1197 = shalt.err (!%p1194_p11)
}
 0x3cb   : > { %976 = dma.vmem_to_hbm [thread:$0]  (%p1355_p3), %s862_s20, 128, %s864_s26, %s848_s25  }
 0x3cc PF: > { %s875_s16 = sand.u32 1, %s1228_s21   ;;  %p1676_p12 = scmp.ge.s32.totalorder %s1240_s24, 2 }
 0x3cd   : > { %s876_s9 = scalar_lea.sflag [#allocation6], %s875_s16 }
 0x3ce   : > { %p987_p13 = pnand %p1676_p12, %p1324_p6 }
 0x3d0   : > { %p988_p0 = pneg %p987_p13 }
 0x3d2   : > { %1223 = dma.done.wait (%p988_p0), %s876_s9, 128  }
 0x3d3   : > { %1225 = vsyncadd (%p988_p0), %s876_s9, 4294967168  ;;  %p20_p5 = scmp.ge.s32.totalorder %s1342_s11, 4   ;;  %s1677_s21 = smov %s1232_s22 }
 0x3d4   : > { %s1678_s22 = smov %s1236_s23  ;;  %s1679_s23 = smov %s1351_s14 }
 0x3d5   : > { %s1680_s24 = smov %s1342_s11  ;;  %22 = sbr.rel (!%p20_p5) target bundleno = 6 (0x6), region = 113 }
 0x3da   :  { %882 = vsyncpa [#allocation5], 1 }
 0x3db   :  { %884 = vsyncpa [#allocation5 + $0x1], 1 }
 0x3dc   :  { %885 = vsyncpa [#allocation8], 1 }
 0x3dd   :  { %886 = vsyncpa [#allocation6], 1 }
 0x3de   :  { %888 = vsyncpa [#allocation6 + $0x1], 1 }

</bundles_post_ra>
